<compile_context>
chip_gen: v6e
topology: v6e:2x2x1
jax: 0.10.0
libtpu: 0.0.40
codegen_flags: <defaults>
</compile_context>

<pallas_src>
import math

import jax
import jax.numpy as jnp
from jax.experimental import pallas as pl
from jax.experimental.pallas import tpu as pltpu


def _postsbn_kernel(gamma_ref, beta_ref, x_ref, o_ref):
    # gamma_ref: (1,)    f32 scalar in SMEM
    # beta_ref : (1, W)  f32 per-lane exponent (same block every grid step)
    # x_ref    : (tm, W) input tile; o_ref: matching output tile
    g = gamma_ref[0]
    x = x_ref[...].astype(jnp.float32)
    b = beta_ref[...]
    # x > 0 assumed, so pow(x, b) == exp(b * log(x)).  log/exp go to the EUP
    # slot, the two muls to the VPU; cast only at the store.
    # TODO(synk): if a bundle dump shows EUP saturation with bf16 I/O on v7x,
    # compute the log/exp chain in bf16 instead of always upcasting to f32.
    o_ref[...] = (g * jnp.exp(b * jnp.log(x))).astype(o_ref.dtype)


def _chip_defaults():
    """(target_block_bytes, min_grid_steps, vmem_cap_bytes) per TPU generation."""
    kind = ""
    try:
        kind = jax.devices()[0].device_kind.lower()
    except Exception:
        pass
    if "7" in kind:
        # v7x: fast HBM -> bigger blocks amortize the ~0.35us/step overhead;
        # 2 TensorCores -> keep >= 2 grid steps per core; 64 MiB physical VMEM.
        return 6 << 20, 4, 56 << 20
    # v5e / v6e: single TensorCore -> no need to manufacture grid steps.
    return 4 << 20, 2, 112 << 20


def _choose_row_tile(rows, row_bytes, target_bytes, min_grid_steps):
    """Sublane-aligned row tile: ~target_bytes per block, a few grid steps."""
    if rows <= 8:
        return rows                                   # tiny input: one block
    tm = max(1, target_bytes // row_bytes)            # rows for ~target block
    tm = min(tm, pl.cdiv(rows, min_grid_steps))       # keep a few grid steps
    tm = max(8, (tm // 8) * 8)                        # multiple of 8 sublanes
    return tm


def post_sbn(x, gamma, beta, *, target_block_bytes=None, min_grid_steps=None):
    """out = gamma * x ** beta, beta broadcast over the last (d_model) axis.

    x: (B, S, D); gamma: (1,); beta: (D,).  x must be > 0 elementwise.
    """
    B, S, D = x.shape
    M = B * S
    itemsize = jnp.dtype(x.dtype).itemsize

    tbb_d, mgs_d, vmem_cap = _chip_defaults()
    tbb = target_block_bytes if target_block_bytes is not None else tbb_d
    mgs = min_grid_steps if min_grid_steps is not None else mgs_d

    gamma_f = gamma.astype(jnp.float32).reshape(1)
    beta_f = beta.astype(jnp.float32).reshape(1, D)

    # Lane-densify factor; cap it so a minimum (8, W) block stays within budget.
    fold = math.lcm(D, 128) // D
    fold_cap = max(1, tbb // (8 * D * itemsize))
    if fold > fold_cap:
        fold = 1            # fallback: full-D blocks (correct; possibly masked vst)
    W = fold * D

    M_main = (M // fold) * fold         # rows handled by the kernel
    rows = M_main // fold

    x2d = x.reshape(M, D)
    out_main = None
    if rows > 0:
        xm = x2d if M_main == M else x2d[:M_main]
        xm = xm.reshape(rows, W)        # contiguous reshape: no HBM copy
        beta_tiled = beta_f if fold == 1 else jnp.tile(beta_f, (1, fold))  # (1, W)

        tm = _choose_row_tile(rows, W * itemsize, tbb, mgs)
        grid = (pl.cdiv(rows, tm),)     # ragged last block: Pallas masks OOB writes
        n_main = rows * W
        block_bytes = tm * W * itemsize

        out_main = pl.pallas_call(
            _postsbn_kernel,
            out_shape=jax.ShapeDtypeStruct((rows, W), x.dtype),
            grid_spec=pltpu.PrefetchScalarGridSpec(
                num_scalar_prefetch=0,
                grid=grid,
                in_specs=[
                    pl.BlockSpec(memory_space=pltpu.MemorySpace.SMEM),  # gamma scalar
                    pl.BlockSpec((1, W), lambda i: (0, 0)),             # beta (resident)
                    pl.BlockSpec((tm, W), lambda i: (i, 0)),            # x tile
                ],
                out_specs=pl.BlockSpec((tm, W), lambda i: (i, 0)),
            ),
            compiler_params=pltpu.CompilerParams(
                dimension_semantics=("parallel",),
                vmem_limit_bytes=min(vmem_cap,
                                     max(32 << 20, 4 * block_bytes + (4 << 20))),
            ),
            cost_estimate=pl.CostEstimate(
                flops=2 * n_main,
                transcendentals=2 * n_main,
                bytes_accessed=2 * n_main * itemsize),
        )(gamma_f, beta_tiled, xm)

    if M_main == M:
        # Common case: no remainder, zero extra HBM copies.
        return out_main.reshape(B, S, D)

    # Tiny remainder (< fold rows, i.e. < W elements): plain jnp, then stitch.
    x_tail = x2d[M_main:]
    out_tail = (gamma_f[0] * jnp.power(x_tail.astype(jnp.float32),
                                       beta_f[0])).astype(x.dtype)
    if out_main is None:
        out2d = out_tail
    else:
        out2d = jnp.concatenate([out_main.reshape(M_main, D), out_tail], axis=0)
    return out2d.reshape(B, S, D)


if __name__ == "__main__":
    key = jax.random.PRNGKey(0)
    k1, k2, k3, k4 = jax.random.split(key, 4)

    # --- Case 1: module-faithful init (gamma = ones(1), beta = ones(d_model)),
    #             d_model = 32 (fold = 4, no remainder, single block).
    B, S, D = 2, 8, 32
    x = jax.random.uniform(k1, (B, S, D), dtype=jnp.float32,
                           minval=0.1, maxval=2.0)   # positive inputs
    gamma = jnp.ones((1,), dtype=jnp.float32)
    beta = jnp.ones((D,), dtype=jnp.float32)

    out = jax.block_until_ready(post_sbn(x, gamma, beta))
    ref = gamma[0] * jnp.power(x, beta[None, None, :])
    assert out.shape == x.shape
    assert jnp.allclose(out, ref, atol=1e-5, rtol=1e-5)

    # --- Case 2: non-trivial gamma/beta + a shape with an M % fold remainder
    #             and a ragged multi-step grid (exercises the jnp tail path).
    B2, S2 = 3, 23
    x_b = jax.random.uniform(k2, (B2, S2, D), dtype=jnp.float32,
                             minval=0.1, maxval=2.0)
    gamma_b = jnp.array([1.7], dtype=jnp.float32)
    beta_b = jax.random.uniform(k3, (D,), dtype=jnp.float32,
                                minval=0.5, maxval=1.5)

    out_b = jax.block_until_ready(post_sbn(x_b, gamma_b, beta_b))
    ref_b = gamma_b[0] * jnp.power(x_b, beta_b[None, None, :])
    assert out_b.shape == x_b.shape
    assert jnp.allclose(out_b, ref_b, atol=1e-5, rtol=1e-5)

    # --- Case 3: d_model already lane-aligned (fold = 1), multi-step grid.
    B3, S3, D3 = 2, 16, 128
    x_c = jax.random.uniform(k4, (B3, S3, D3), dtype=jnp.float32,
                             minval=0.1, maxval=2.0)
    gamma_c = jnp.array([0.9], dtype=jnp.float32)
    beta_c = jnp.linspace(0.5, 1.5, D3, dtype=jnp.float32)

    out_c = jax.block_until_ready(post_sbn(x_c, gamma_c, beta_c))
    ref_c = gamma_c[0] * jnp.power(x_c, beta_c[None, None, :])
    assert out_c.shape == x_c.shape
    assert jnp.allclose(out_c, ref_c, atol=1e-5, rtol=1e-5)

    print("KERNEL_OK")
</pallas_src>

<mosaic_0001>
module attributes {stable_mosaic.version = 11 : i64} {
  func.func @_postsbn_kernel(%arg0: i32, %arg1: memref<1xf32, #tpu.memory_space<smem>>, %arg2: memref<1x128xf32, #tpu.memory_space<vmem>>, %arg3: memref<4x128xf32, #tpu.memory_space<vmem>>, %arg4: memref<4x128xf32, #tpu.memory_space<vmem>>) attributes {dimension_semantics = [#tpu.dimension_semantics<parallel>], iteration_bounds = array<i64: 1>, scalar_prefetch = 0 : i64, scratch_operands = 0 : i64, tpu.core_type = #tpu.core_type<tc>, window_params = [{transform_indices = @transform_0, window_bounds = array<i64: 1>}, {pipeline_mode = #tpu.pipeline_mode<synchronous>, transform_indices = @transform_1, window_bounds = array<i64: 1, 128>}, {transform_indices = @transform_2, window_bounds = array<i64: 4, 128>}, {transform_indices = @transform_3, window_bounds = array<i64: 4, 128>}]} {
    %c0 = arith.constant 0 : index
    %0 = memref.load %arg1[%c0] : memref<1xf32, #tpu.memory_space<smem>>
    %c0_0 = arith.constant 0 : index
    %c0_1 = arith.constant 0 : index
    %1 = vector.load %arg3[%c0_0, %c0_1] : memref<4x128xf32, #tpu.memory_space<vmem>>, vector<4x128xf32>
    %c0_2 = arith.constant 0 : index
    %c0_3 = arith.constant 0 : index
    %2 = vector.load %arg2[%c0_2, %c0_3] : memref<1x128xf32, #tpu.memory_space<vmem>>, vector<1x128xf32>
    %3 = math.log %1 : vector<4x128xf32>
    %4 = vector.broadcast %2 : vector<1x128xf32> to vector<4x128xf32>
    %5 = arith.mulf %4, %3 : vector<4x128xf32>
    %6 = math.exp %5 : vector<4x128xf32>
    %7 = vector.broadcast %0 : f32 to vector<4x128xf32>
    %8 = arith.mulf %7, %6 : vector<4x128xf32>
    %c0_4 = arith.constant 0 : index
    %c0_5 = arith.constant 0 : index
    %9 = vector.load %arg4[%c0_4, %c0_5] : memref<4x128xf32, #tpu.memory_space<vmem>>, vector<4x128xf32>
    tpu.vector_store %arg4[%c0_4, %c0_5], %8 {strides = array<i32>} : memref<4x128xf32, #tpu.memory_space<vmem>>, vector<4x128xf32>,
    return
  }
  func.func @transform_0(%arg0: i32) -> i32 {
    %c0_i32 = arith.constant 0 : i32
    %c0_i32_0 = arith.constant 0 : i32
    return %c0_i32 : i32
  }
  func.func @transform_1(%arg0: i32) -> (i32, i32) {
    %c0_i32 = arith.constant 0 : i32
    %c0_i32_0 = arith.constant 0 : i32
    %c0_i32_1 = arith.constant 0 : i32
    return %c0_i32, %c0_i32_0 : i32, i32
  }
  func.func @transform_2(%arg0: i32) -> (i32, i32) {
    %c0_i32 = arith.constant 0 : i32
    %c0_i32_0 = arith.constant 0 : i32
    return %arg0, %c0_i32 : i32, i32
  }
  func.func @transform_3(%arg0: i32) -> (i32, i32) {
    %c0_i32 = arith.constant 0 : i32
    %c0_i32_0 = arith.constant 0 : i32
    return %arg0, %c0_i32 : i32, i32
  }
}

</mosaic_0001>

<bundles_post_ra>
// kernel: tpu_custom_call.1
= control target key start
LH: loop header
LB: loop body
LE: loop exit
PB: predicated region body
PF: predicated region fallthrough
CT: control target
= control target key end

     0   :  { %9 = vsyncpa [#allocation4], 0  ;;  %s145_s0 = inlined_call_operand.<no memory space> [shape: f32[1], index: 0, kind: input, shape index: {}]   ;;  %s146_s1 = inlined_call_operand.vmem [shape: f32[1,128], index: 1, kind: input, shape index: {}]   ;;  %s147_s2 = inlined_call_operand.hbm [shape: f32[4,128], index: 2, kind: input, shape index: {}]   ;;  %s148_s3 = inlined_call_operand.hbm [shape: f32[4,128], index: 3, kind: output, shape index: {}]  }
   0x1   :  { %10 = vsyncpa [#allocation5], 0  ;;  %s111_s12 = smov [#allocation3]  }
   0x2   :  { %s21_s13 = sshll.u32 %s111_s12, 4  ;;  %s22_s13 = int_to_ptr.vmem [resolvable:$true] %s21_s13 }
   0x3   :  { %s75_s14 = scalar_lea.vmem %s22_s13, 64  ;;  %p80_p1 = scmp.lt.s32.totalorder %s22_s13, %s22_s13 }
   0x4   :  { %p76_p0 = scmp.ne.s32.totalorder %s22_s13, %s75_s14  ;;  %p81_p2 = scmp.lt.s32.totalorder %s75_s14, %s75_s14 }
   0x6   :  { %p82_p3 = por %p81_p2, %p80_p1 }
   0x8   :  { %p83_p4 = pnand %p82_p3, %p76_p0 }
   0xa   :  { %86 = shalt.err (!%p83_p4)
}
   0xb   :  { %24 = dma.hbm_to_vmem [thread:$0]  %s147_s2, 64, %s22_s13, [#allocation4]  }
   0xc   :  { %107 = dma.done.wait [#allocation4], 64  }
   0xd   :  { %108 = vsyncadd [#allocation4], 4294967232  ;;  %v29_v0 = vld [vmem:[#allocation3] sm:$0xf]  ;;  %v42_v6 = vstv %s145_s0  ;;  %s112_s21 = smov [#allocation6]  }
   0xe   :  { %63 = vlog2.f32 %v29_v0  ;;  %v60_v2 = vld [vmem:[%s146_s1] ss:$0 sm:$0xff]  ;;  %s51_s22 = sshll.u32 %s112_s21, 4  ;;  %s52_s22 = int_to_ptr.vmem [resolvable:$true] %s51_s22 }
   0xf   :  { %s87_s2 = scalar_lea.vmem %s52_s22, 64  ;;  %p92_p6 = scmp.lt.s32.totalorder %s52_s22, %s52_s22 }
  0x10   :  { %p88_p5 = scmp.ne.s32.totalorder %s52_s22, %s87_s2  ;;  %p93_p7 = scmp.lt.s32.totalorder %s87_s2, %s87_s2 }
  0x12   :  { %p94_p8 = por %p93_p7, %p92_p6 }
  0x14   :  { %p95_p9 = pnand %p94_p8, %p88_p5 }
  0x1b   :  { %v64_v1 = vpop.eup %63 }
  0x1c   :  { %v32_v3 = vmul.f32 0.6931472, %v64_v1 }
  0x1e   :  { %v39_v4 = vmul.f32 %v60_v2, %v32_v3 }
  0x20   :  { %v40_v5 = vmul.f32 1.442695, %v39_v4 }
  0x22   :  { %65 = vpow2.f32 %v40_v5 }
  0x2f   :  { %v66_v7 = vpop.eup %65 }
  0x30   :  { %v43_v8 = vmul.f32 %v66_v7, %v42_v6 }
  0x32   :  { %44 = vst [vmem:[#allocation6] sm:$0xf] %v43_v8 }
  0x33   :  { %98 = shalt.err (!%p95_p9)
}
  0x34   :  { %54 = dma.vmem_to_hbm [thread:$0]  %s52_s22, 64, %s148_s3, [#allocation5]  }
  0x35   :  { %109 = dma.done.wait [#allocation5], 64  }
  0x36   :  { %110 = vsyncadd [#allocation5], 4294967232 }
  0x37   :  { %58 = vsyncpa [#allocation4], 1 }
  0x38   :  { %59 = vsyncpa [#allocation5], 1 }

</bundles_post_ra>
